<compile_context>
chip_gen: v7x
topology: tpu7x:2x2x1
jax: 0.10.0
libtpu: 0.0.40
codegen_flags: <defaults>
</compile_context>

<pallas_src>
import jax
import jax.numpy as jnp
from jax.experimental import pallas as pl
from jax.experimental.pallas import tpu as pltpu

H = 32          # embedding_dim == hidden_dim
V = 64          # out_vocab_size
G3 = 3 * H      # fused gate width (r|z|n) = 96
GP = 128        # per-source gate width padded to one lane tile
VP = 128        # vocab width padded to one lane tile
NEG = -1e30     # bias pad value -> pad lanes contribute exp(-inf)=0 to softmax


def decoder_gru_kernel(tok_ref,     # SMEM scalar-prefetch: (T,) int32 token ids
                       emb_ref,     # (V, H)   embedding table, VMEM-resident
                       h0_ref,      # (1, H)   initial hidden state
                       w_cat_ref,   # (2H, 256) block-diag [[W_ih_pad, 0],[0, W_hh_pad]], gate order r|z|n
                       b_cat_ref,   # (1, 256)  [b_ih_pad | b_hh_pad]
                       w_out_ref,   # (H, VP)   output projection (zero-padded cols)
                       b_out_ref,   # (1, VP)   output bias (NEG in pad lanes)
                       logp_ref,    # out: (T_pad, VP) log-prob slab
                       h_out_ref):  # out: (1, H) final hidden state
    T = tok_ref.shape[0]            # static

    # Deterministic pad rows (sliced away outside); one tiny slab store.
    logp_ref[...] = jnp.zeros_like(logp_ref)

    w_cat = w_cat_ref[...]
    b_cat = b_cat_ref[...]
    w_out = w_out_ref[...]
    b_out = b_out_ref[...]

    h = h0_ref[...]                 # (1, H) hidden carried in registers across steps

    # T is small & static -> static Python loop == fully-unrolled fori_loop,
    # all row indices are concrete (static slices, unmasked-friendly stores).
    for t in range(T):
        tok = tok_ref[t]                                        # scalar from SMEM
        x = jnp.maximum(emb_ref[pl.ds(tok, 1), :], 0.0)         # relu(embedding(tok)), (1, H)

        # One fused MXU GEMV: [x | h] (1, 2H) @ block-diagonal (2H, 256).
        xh = jnp.concatenate([x, h], axis=1)                    # (1, 2H)
        g = jnp.dot(xh, w_cat, preferred_element_type=jnp.float32) + b_cat   # (1, 256)
        gi = g[:, :GP]                                          # lanes   0:128 (tile-boundary slice)
        gh = g[:, GP:]                                          # lanes 128:256
        s = gi + gh                                             # shared r/z pre-activation, one VALU add

        # PyTorch nn.GRU gate order (r, z, n); n = tanh(gi_n + r * gh_n).
        r = jax.nn.sigmoid(s[:, 0:H])
        z = jax.nn.sigmoid(s[:, H:2 * H])
        n = jnp.tanh(gi[:, 2 * H:G3] + r * gh[:, 2 * H:G3])
        h = n + z * (h - n)                                     # == (1 - z) * n + z * h

        # Output projection + numerically stable log_softmax over 128 lanes.
        logits = jnp.dot(h, w_out, preferred_element_type=jnp.float32) + b_out
        m = jnp.max(logits, axis=-1, keepdims=True)
        lse = m + jnp.log(jnp.sum(jnp.exp(logits - m), axis=-1, keepdims=True))
        logp_ref[pl.ds(t, 1), :] = logits - lse                 # row t of the dense slab

    h_out_ref[...] = h                                          # single hidden write


def _pack_params(params):
    """Boundary-only layout plumbing: fuse gates, build block-diag RHS, pad to lane tiles."""
    emb, w_ih, w_hh, b_ih, b_hh, w_out, b_out = params
    w_ih_cat = jnp.concatenate([w_ih[0], w_ih[1], w_ih[2]], axis=1)       # (H, 3H)
    w_hh_cat = jnp.concatenate([w_hh[0], w_hh[1], w_hh[2]], axis=1)       # (H, 3H)
    b_ih_cat = jnp.concatenate([b_ih[0], b_ih[1], b_ih[2]], axis=1)       # (1, 3H)
    b_hh_cat = jnp.concatenate([b_hh[0], b_hh[1], b_hh[2]], axis=1)       # (1, 3H)

    w_ih_p = jnp.pad(w_ih_cat, ((0, 0), (0, GP - G3)))                    # (H, 128)
    w_hh_p = jnp.pad(w_hh_cat, ((0, 0), (0, GP - G3)))                    # (H, 128)
    zeros = jnp.zeros((H, GP), jnp.float32)
    w_cat = jnp.concatenate(
        [jnp.concatenate([w_ih_p, zeros], axis=1),                        # x rows -> lanes 0:128
         jnp.concatenate([zeros, w_hh_p], axis=1)], axis=0)               # h rows -> lanes 128:256
    b_cat = jnp.concatenate(
        [jnp.pad(b_ih_cat, ((0, 0), (0, GP - G3))),
         jnp.pad(b_hh_cat, ((0, 0), (0, GP - G3)))], axis=1)              # (1, 256)

    w_out_p = jnp.pad(w_out, ((0, 0), (0, VP - V)))                       # (H, 128)
    b_out_p = jnp.pad(b_out, ((0, 0), (0, VP - V)), constant_values=NEG)  # (1, 128)
    return emb, w_cat, b_cat, w_out_p, b_out_p


def decoder_gru_decode(tokens, hidden, params):
    """Run T teacher-forced decode steps in ONE kernel invocation.

    tokens: (T,) int32; hidden: (1, 1, H). Returns ((T, V) log-probs, (1, 1, H) hidden).
    T=1 is exactly DecoderGRU.forward.
    """
    emb, w_cat, b_cat, w_out_p, b_out_p = _pack_params(params)
    T = int(tokens.shape[0])
    T_pad = ((T + 7) // 8) * 8                       # sublane-dense output slab
    h0 = hidden.reshape(1, H)

    grid_spec = pltpu.PrefetchScalarGridSpec(
        num_scalar_prefetch=1,
        grid=(1,),                                   # single invocation; loop lives in-kernel
        in_specs=[
            pl.BlockSpec((V, H), lambda i, tok: (0, 0)),          # full embedding table (8 KiB)
            pl.BlockSpec((1, H), lambda i, tok: (0, 0)),          # initial hidden
            pl.BlockSpec((2 * H, 2 * GP), lambda i, tok: (0, 0)), # fused block-diag gate weights
            pl.BlockSpec((1, 2 * GP), lambda i, tok: (0, 0)),     # fused gate bias
            pl.BlockSpec((H, VP), lambda i, tok: (0, 0)),         # output projection
            pl.BlockSpec((1, VP), lambda i, tok: (0, 0)),         # output bias (NEG pad)
        ],
        out_specs=[
            pl.BlockSpec((T_pad, VP), lambda i, tok: (0, 0)),     # lane+sublane-dense log-prob slab
            pl.BlockSpec((1, H), lambda i, tok: (0, 0)),          # final hidden
        ],
    )

    cost = pl.CostEstimate(
        flops=T * (2 * (2 * H) * (2 * GP) + 2 * H * VP),
        transcendentals=T * (3 * H + VP),
        bytes_accessed=4 * (V * H + 2 * H * 2 * GP + 2 * GP + H * VP + VP
                            + T_pad * VP + 2 * H + T),
    )

    logp_p, h_new = pl.pallas_call(
        decoder_gru_kernel,
        grid_spec=grid_spec,
        out_shape=(jax.ShapeDtypeStruct((T_pad, VP), jnp.float32),
                   jax.ShapeDtypeStruct((1, H), jnp.float32)),
        compiler_params=pltpu.CompilerParams(
            dimension_semantics=("arbitrary",)),
        cost_estimate=cost,
    )(tokens.astype(jnp.int32), emb, h0, w_cat, b_cat, w_out_p, b_out_p)

    return logp_p[:T, :V], h_new.reshape(1, 1, H)


def decoder_gru_step(token, hidden, params):
    """Exact equivalent of DecoderGRU.forward (single decode step)."""
    logp, h_new = decoder_gru_decode(token.reshape(1).astype(jnp.int32), hidden, params)
    return logp, h_new


# ---------------- pure-JAX references ----------------

def decoder_gru_ref(token, hidden, params):
    emb, w_ih, w_hh, b_ih, b_hh, w_out, b_out = params
    x = jnp.maximum(emb[token[0]][None, :], 0.0)
    h = hidden.reshape(1, H)
    gi = [x @ w_ih[g] + b_ih[g] for g in range(3)]
    gh = [h @ w_hh[g] + b_hh[g] for g in range(3)]
    r = jax.nn.sigmoid(gi[0] + gh[0])
    z = jax.nn.sigmoid(gi[1] + gh[1])
    n = jnp.tanh(gi[2] + r * gh[2])
    h_new = (1.0 - z) * n + z * h
    logits = h_new @ w_out + b_out
    logp = jax.nn.log_softmax(logits, axis=1)
    return logp, h_new.reshape(1, 1, H)


def decoder_gru_ref_decode(tokens, hidden, params):
    h = hidden
    outs = []
    for t in range(tokens.shape[0]):
        logp, h = decoder_gru_ref(tokens[t:t + 1], h, params)
        outs.append(logp)
    return jnp.concatenate(outs, axis=0), h


def init_params(key):
    ks = jax.random.split(key, 7)
    s = 1.0 / jnp.sqrt(H)
    emb = jax.random.normal(ks[0], (V, H), jnp.float32)
    w_ih = jax.random.uniform(ks[1], (3, H, H), jnp.float32, -s, s)
    w_hh = jax.random.uniform(ks[2], (3, H, H), jnp.float32, -s, s)
    b_ih = jax.random.uniform(ks[3], (3, 1, H), jnp.float32, -s, s)
    b_hh = jax.random.uniform(ks[4], (3, 1, H), jnp.float32, -s, s)
    w_out = jax.random.uniform(ks[5], (H, V), jnp.float32, -s, s)
    b_out = jax.random.uniform(ks[6], (1, V), jnp.float32, -s, s)
    return emb, w_ih, w_hh, b_ih, b_hh, w_out, b_out


if __name__ == "__main__":
    key = jax.random.PRNGKey(0)
    pkey, hkey, tkey, skey = jax.random.split(key, 4)

    params = init_params(pkey)
    hidden = jax.random.normal(hkey, (1, 1, H), jnp.float32)   # prev hidden state

    # --- single decode step (exactly the module's forward) ---
    token = jax.random.randint(tkey, (1,), 0, V, jnp.int32)
    logp, h_new = jax.jit(decoder_gru_step)(token, hidden, params)
    logp, h_new = jax.block_until_ready((logp, h_new))
    logp_ref, h_ref = decoder_gru_ref(token, hidden, params)
    assert logp.shape == (1, V) and h_new.shape == (1, 1, H)
    assert jnp.allclose(logp, logp_ref, atol=1e-5, rtol=1e-5)
    assert jnp.allclose(h_new, h_ref, atol=1e-5, rtol=1e-5)

    # --- T teacher-forced steps in a single kernel invocation ---
    T = 8
    tokens = jax.random.randint(skey, (T,), 0, V, jnp.int32)
    logp_seq, h_seq = jax.jit(decoder_gru_decode)(tokens, hidden, params)
    logp_seq, h_seq = jax.block_until_ready((logp_seq, h_seq))
    logp_seq_ref, h_seq_ref = decoder_gru_ref_decode(tokens, hidden, params)
    assert logp_seq.shape == (T, V) and h_seq.shape == (1, 1, H)
    assert jnp.allclose(logp_seq, logp_seq_ref, atol=1e-4, rtol=1e-4)
    assert jnp.allclose(h_seq, h_seq_ref, atol=1e-4, rtol=1e-4)

    print("KERNEL_OK")
</pallas_src>

<mosaic_0001>
module attributes {stable_mosaic.version = 11 : i64} {
  func.func @decoder_gru_kernel(%arg0: i32, %arg1: memref<1xi32, #tpu.memory_space<smem>>, %arg2: memref<64x32xf32, #tpu.memory_space<vmem>>, %arg3: memref<1x32xf32, #tpu.memory_space<vmem>>, %arg4: memref<64x256xf32, #tpu.memory_space<vmem>>, %arg5: memref<1x256xf32, #tpu.memory_space<vmem>>, %arg6: memref<32x128xf32, #tpu.memory_space<vmem>>, %arg7: memref<1x128xf32, #tpu.memory_space<vmem>>, %arg8: memref<8x128xf32, #tpu.memory_space<vmem>>, %arg9: memref<1x32xf32, #tpu.memory_space<vmem>>) attributes {dimension_semantics = [#tpu.dimension_semantics<arbitrary>], iteration_bounds = array<i64: 1>, scalar_prefetch = 1 : i64, scratch_operands = 0 : i64, tpu.core_type = #tpu.core_type<tc>, window_params = [{pipeline_mode = #tpu.pipeline_mode<synchronous>, transform_indices = @transform_0, window_bounds = array<i64: 64, 32>}, {pipeline_mode = #tpu.pipeline_mode<synchronous>, transform_indices = @transform_1, window_bounds = array<i64: 1, 32>}, {pipeline_mode = #tpu.pipeline_mode<synchronous>, transform_indices = @transform_2, window_bounds = array<i64: 64, 256>}, {pipeline_mode = #tpu.pipeline_mode<synchronous>, transform_indices = @transform_3, window_bounds = array<i64: 1, 256>}, {pipeline_mode = #tpu.pipeline_mode<synchronous>, transform_indices = @transform_4, window_bounds = array<i64: 32, 128>}, {pipeline_mode = #tpu.pipeline_mode<synchronous>, transform_indices = @transform_5, window_bounds = array<i64: 1, 128>}, {pipeline_mode = #tpu.pipeline_mode<synchronous>, transform_indices = @transform_6, window_bounds = array<i64: 8, 128>}, {pipeline_mode = #tpu.pipeline_mode<synchronous>, transform_indices = @transform_7, window_bounds = array<i64: 1, 32>}]} {
    %cst = arith.constant 0.000000e+00 : f32
    %0 = vector.broadcast %cst : f32 to vector<8x128xf32>
    %c0 = arith.constant 0 : index
    %c0_0 = arith.constant 0 : index
    %1 = vector.load %arg8[%c0, %c0_0] : memref<8x128xf32, #tpu.memory_space<vmem>>, vector<8x128xf32>
    tpu.vector_store %arg8[%c0, %c0_0], %0 {strides = array<i32>} : memref<8x128xf32, #tpu.memory_space<vmem>>, vector<8x128xf32>,
    %c0_1 = arith.constant 0 : index
    %c0_2 = arith.constant 0 : index
    %2 = vector.load %arg4[%c0_1, %c0_2] : memref<64x256xf32, #tpu.memory_space<vmem>>, vector<64x256xf32>
    %c0_3 = arith.constant 0 : index
    %c0_4 = arith.constant 0 : index
    %3 = vector.load %arg5[%c0_3, %c0_4] : memref<1x256xf32, #tpu.memory_space<vmem>>, vector<1x256xf32>
    %c0_5 = arith.constant 0 : index
    %c0_6 = arith.constant 0 : index
    %4 = vector.load %arg6[%c0_5, %c0_6] : memref<32x128xf32, #tpu.memory_space<vmem>>, vector<32x128xf32>
    %c0_7 = arith.constant 0 : index
    %c0_8 = arith.constant 0 : index
    %5 = vector.load %arg7[%c0_7, %c0_8] : memref<1x128xf32, #tpu.memory_space<vmem>>, vector<1x128xf32>
    %c0_9 = arith.constant 0 : index
    %c0_10 = arith.constant 0 : index
    %6 = vector.load %arg3[%c0_9, %c0_10] : memref<1x32xf32, #tpu.memory_space<vmem>>, vector<1x32xf32>
    %c0_11 = arith.constant 0 : index
    %7 = memref.load %arg1[%c0_11] : memref<1xi32, #tpu.memory_space<smem>>
    %8 = arith.index_cast %7 : i32 to index
    %c0_12 = arith.constant 0 : index
    %9 = vector.load %arg2[%8, %c0_12] : memref<64x32xf32, #tpu.memory_space<vmem>>, vector<1x32xf32>
    %cst_13 = arith.constant 0.000000e+00 : f32
    %10 = vector.broadcast %cst_13 : f32 to vector<1x32xf32>
    %11 = arith.maximumf %9, %10 : vector<1x32xf32>
    %12 = tpu.concatenate %11, %6 in 1 : vector<1x32xf32>, vector<1x32xf32> -> vector<1x64xf32>
    %cst_14 = arith.constant dense<0.000000e+00> : vector<1x256xf32>
    %13 = tpu.matmul %12, %2, %cst_14 {dimension_numbers = #tpu.dot_dimension_numbers<[1], [0], [0], [1], [0, 0, 1, 1], [], []>} : vector<1x64xf32>, vector<64x256xf32>, vector<1x256xf32> -> vector<1x256xf32>
    %14 = arith.addf %13, %3 : vector<1x256xf32>
    %15 = vector.extract_strided_slice %14 {offsets = [0, 0], sizes = [1, 128], strides = [1, 1]} : vector<1x256xf32> to vector<1x128xf32>
    %16 = vector.extract_strided_slice %14 {offsets = [0, 128], sizes = [1, 128], strides = [1, 1]} : vector<1x256xf32> to vector<1x128xf32>
    %17 = arith.addf %15, %16 : vector<1x128xf32>
    %18 = vector.extract_strided_slice %17 {offsets = [0, 0], sizes = [1, 32], strides = [1, 1]} : vector<1x128xf32> to vector<1x32xf32>
    %19 = arith.negf %18 : vector<1x32xf32>
    %20 = math.exp %19 : vector<1x32xf32>
    %cst_15 = arith.constant 1.000000e+00 : f32
    %21 = vector.broadcast %cst_15 : f32 to vector<1x32xf32>
    %22 = arith.addf %21, %20 : vector<1x32xf32>
    %23 = arith.divf %21, %22 : vector<1x32xf32>
    %24 = vector.extract_strided_slice %17 {offsets = [0, 32], sizes = [1, 32], strides = [1, 1]} : vector<1x128xf32> to vector<1x32xf32>
    %25 = arith.negf %24 : vector<1x32xf32>
    %26 = math.exp %25 : vector<1x32xf32>
    %cst_16 = arith.constant 1.000000e+00 : f32
    %27 = vector.broadcast %cst_16 : f32 to vector<1x32xf32>
    %28 = arith.addf %27, %26 : vector<1x32xf32>
    %29 = arith.divf %27, %28 : vector<1x32xf32>
    %30 = vector.extract_strided_slice %15 {offsets = [0, 64], sizes = [1, 32], strides = [1, 1]} : vector<1x128xf32> to vector<1x32xf32>
    %31 = vector.extract_strided_slice %16 {offsets = [0, 64], sizes = [1, 32], strides = [1, 1]} : vector<1x128xf32> to vector<1x32xf32>
    %32 = arith.mulf %23, %31 : vector<1x32xf32>
    %33 = arith.addf %30, %32 : vector<1x32xf32>
    %34 = math.tanh %33 : vector<1x32xf32>
    %35 = arith.subf %6, %34 : vector<1x32xf32>
    %36 = arith.mulf %29, %35 : vector<1x32xf32>
    %37 = arith.addf %34, %36 : vector<1x32xf32>
    %cst_17 = arith.constant dense<0.000000e+00> : vector<1x128xf32>
    %38 = tpu.matmul %37, %4, %cst_17 {dimension_numbers = #tpu.dot_dimension_numbers<[1], [0], [0], [1], [0, 0, 1, 1], [], []>} : vector<1x32xf32>, vector<32x128xf32>, vector<1x128xf32> -> vector<1x128xf32>
    %39 = arith.addf %38, %5 : vector<1x128xf32>
    %cst_18 = arith.constant dense<0xFF800000> : vector<1xf32>
    %40 = vector.multi_reduction <maximumf>, %39, %cst_18 [1] : vector<1x128xf32> to vector<1xf32>
    %41 = vector.shape_cast %40 : vector<1xf32> to vector<1x1xf32>
    %42 = vector.broadcast %41 : vector<1x1xf32> to vector<1x128xf32>
    %43 = arith.subf %39, %42 : vector<1x128xf32>
    %44 = math.exp %43 : vector<1x128xf32>
    %cst_19 = arith.constant dense<0.000000e+00> : vector<1xf32>
    %45 = vector.multi_reduction <add>, %44, %cst_19 [1] : vector<1x128xf32> to vector<1xf32>
    %46 = vector.shape_cast %45 : vector<1xf32> to vector<1x1xf32>
    %47 = math.log %46 : vector<1x1xf32>
    %48 = arith.addf %41, %47 : vector<1x1xf32>
    %49 = vector.broadcast %48 : vector<1x1xf32> to vector<1x128xf32>
    %50 = arith.subf %39, %49 : vector<1x128xf32>
    %c0_20 = arith.constant 0 : index
    %c0_21 = arith.constant 0 : index
    %51 = vector.load %arg8[%c0_20, %c0_21] : memref<8x128xf32, #tpu.memory_space<vmem>>, vector<1x128xf32>
    tpu.vector_store %arg8[%c0_20, %c0_21], %50 {strides = array<i32>} : memref<8x128xf32, #tpu.memory_space<vmem>>, vector<1x128xf32>,
    %c0_22 = arith.constant 0 : index
    %c0_23 = arith.constant 0 : index
    %52 = vector.load %arg9[%c0_22, %c0_23] : memref<1x32xf32, #tpu.memory_space<vmem>>, vector<1x32xf32>
    tpu.vector_store %arg9[%c0_22, %c0_23], %37 {strides = array<i32>} : memref<1x32xf32, #tpu.memory_space<vmem>>, vector<1x32xf32>,
    return
  }
  func.func @transform_0(%arg0: i32, %arg1: memref<1xi32, #tpu.memory_space<smem>>) -> (i32, i32) {
    %c0_i32 = arith.constant 0 : i32
    %c0_i32_0 = arith.constant 0 : i32
    %c0_i32_1 = arith.constant 0 : i32
    return %c0_i32, %c0_i32_0 : i32, i32
  }
  func.func @transform_1(%arg0: i32, %arg1: memref<1xi32, #tpu.memory_space<smem>>) -> (i32, i32) {
    %c0_i32 = arith.constant 0 : i32
    %c0_i32_0 = arith.constant 0 : i32
    %c0_i32_1 = arith.constant 0 : i32
    return %c0_i32, %c0_i32_0 : i32, i32
  }
  func.func @transform_2(%arg0: i32, %arg1: memref<1xi32, #tpu.memory_space<smem>>) -> (i32, i32) {
    %c0_i32 = arith.constant 0 : i32
    %c0_i32_0 = arith.constant 0 : i32
    %c0_i32_1 = arith.constant 0 : i32
    return %c0_i32, %c0_i32_0 : i32, i32
  }
  func.func @transform_3(%arg0: i32, %arg1: memref<1xi32, #tpu.memory_space<smem>>) -> (i32, i32) {
    %c0_i32 = arith.constant 0 : i32
    %c0_i32_0 = arith.constant 0 : i32
    %c0_i32_1 = arith.constant 0 : i32
    return %c0_i32, %c0_i32_0 : i32, i32
  }
  func.func @transform_4(%arg0: i32, %arg1: memref<1xi32, #tpu.memory_space<smem>>) -> (i32, i32) {
    %c0_i32 = arith.constant 0 : i32
    %c0_i32_0 = arith.constant 0 : i32
    %c0_i32_1 = arith.constant 0 : i32
    return %c0_i32, %c0_i32_0 : i32, i32
  }
  func.func @transform_5(%arg0: i32, %arg1: memref<1xi32, #tpu.memory_space<smem>>) -> (i32, i32) {
    %c0_i32 = arith.constant 0 : i32
    %c0_i32_0 = arith.constant 0 : i32
    %c0_i32_1 = arith.constant 0 : i32
    return %c0_i32, %c0_i32_0 : i32, i32
  }
  func.func @transform_6(%arg0: i32, %arg1: memref<1xi32, #tpu.memory_space<smem>>) -> (i32, i32) {
    %c0_i32 = arith.constant 0 : i32
    %c0_i32_0 = arith.constant 0 : i32
    %c0_i32_1 = arith.constant 0 : i32
    return %c0_i32, %c0_i32_0 : i32, i32
  }
  func.func @transform_7(%arg0: i32, %arg1: memref<1xi32, #tpu.memory_space<smem>>) -> (i32, i32) {
    %c0_i32 = arith.constant 0 : i32
    %c0_i32_0 = arith.constant 0 : i32
    %c0_i32_1 = arith.constant 0 : i32
    return %c0_i32, %c0_i32_0 : i32, i32
  }
}

</mosaic_0001>

<bundles_post_ra>
// kernel: decoder_gru_step.1
= control target key start
LH: loop header
LB: loop body
LE: loop exit
PB: predicated region body
PF: predicated region fallthrough
CT: control target
= control target key end

     0   :  { %v57_v0 = vlaneseq  ;;  %v397_v12 = vmov 0.0   ;;  %s568_s0 = inlined_call_operand.<no memory space> [shape: s32[1], index: 0, kind: input, shape index: {}]   ;;  %s569_s1 = inlined_call_operand.vmem [shape: f32[64,32], index: 1, kind: input, shape index: {}]   ;;  %s570_s2 = inlined_call_operand.vmem [shape: f32[1,32], index: 2, kind: input, shape index: {}]   ;;  %s571_s3 = inlined_call_operand.vmem [shape: f32[64,256], index: 3, kind: input, shape index: {}]   ;;  %s572_s4 = inlined_call_operand.vmem [shape: f32[1,256], index: 4, kind: input, shape index: {}]   ;;  %s573_s5 = inlined_call_operand.vmem [shape: f32[32,128], index: 5, kind: input, shape index: {}]   ;;  %s574_s6 = inlined_call_operand.vmem [shape: f32[1,128], index: 6, kind: input, shape index: {}]   ;;  %s575_s7 = inlined_call_operand.vmem [shape: f32[8,128], index: 7, kind: output, shape index: {0}]   ;;  %s576_s8 = inlined_call_operand.hbm [shape: f32[1,32], index: 8, kind: output, shape index: {1}]  }
   0x1   :  { %v30_v1 = vld [vmem:[%s571_s3 + $0x8] sm:$0xff]  ;;  %v32_v2 = vld [vmem:[%s571_s3 + $0x18] sm:$0xff]  ;;  %v29_v4 = vld [vmem:[%s571_s3] sm:$0xff]  ;;  %28 = vst [vmem:[%s575_s7] sm:$0xff] %v397_v12  ;;  %145 = vmatprep.mubr.f32.mxu0 %v397_v12 }
   0x2   :  { %v334_v3 = vpack.c.bf16 %v32_v2, %v30_v1  ;;  %v31_v5 = vld [vmem:[%s571_s3 + $0x10] sm:$0xff]  ;;  %v34_v6 = vld [vmem:[%s571_s3 + $0x28] sm:$0xff]  ;;  %v464_v7 = vshrl.u32 %v57_v0, 7  ;;  %v36_v9 = vld [vmem:[%s571_s3 + $0x38] sm:$0xff] }
   0x3   :  { %v336_v8 = vpack.c.bf16 %v31_v5, %v29_v4  ;;  %v33_v10 = vld [vmem:[%s571_s3 + $0x20] sm:$0xff]  ;;  %v35_v11 = vld [vmem:[%s571_s3 + $0x30] sm:$0xff]  ;;  %v338_v14 = vpack.c.bf16 %v36_v9, %v34_v6  ;;  %v38_v15 = vld [vmem:[%s571_s3 + $0x48] sm:$0xff] }
   0x4   :  { %v483_v13 = vld [vmem:[%s570_s2] sm:$0x1]  ;;  %335 = vmatprep.subr.bf16.mxu0 %v334_v3  ;;  %v40_v16 = vld [vmem:[%s571_s3 + $0x58] sm:$0xff]  ;;  %v492_v17 = vsub.s32 0, %v464_v7  ;;  %v340_v18 = vpack.c.bf16 %v35_v11, %v33_v10  ;;  %v39_v21 = vld [vmem:[%s571_s3 + $0x50] sm:$0xff] }
   0x5   :  { %337 = vmatpush1.bf16.msra.mxu0 %v336_v8  ;;  %v342_v19 = vpack.c.bf16 %v40_v16, %v38_v15  ;;  %v37_v20 = vld [vmem:[%s571_s3 + $0x40] sm:$0xff]  ;;  %v42_v23 = vld [vmem:[%s571_s3 + $0x68] sm:$0xff]  ;;  %v44_v24 = vld [vmem:[%s571_s3 + $0x78] sm:$0xff] }
   0x6   :  { %339 = vmatprep.subr.bf16.mxu0 %v338_v14  ;;  %v60_v22 = vrot.slane %v483_v13, %v492_v17 }
   0x7   :  { %15 = vsyncpa [#allocation5], 0  ;;  %s398_s14 = smov 32   ;;  %v344_v25 = vpack.c.bf16 %v39_v21, %v37_v20  ;;  %v346_v26 = vpack.c.bf16 %v44_v24, %v42_v23  ;;  %v41_v27 = vld [vmem:[%s571_s3 + $0x60] sm:$0xff]  ;;  %v43_v28 = vld [vmem:[%s571_s3 + $0x70] sm:$0xff]  ;;  %s53_s23 = scalar_lea.vmem %s569_s1, %s568_s0  ;;  %vm64_vm0 = vcmask 261120  }
   0x8   :  { %61 = vrot.lane.b32.xlu0 %v60_v22, %s398_s14  ;;  %v348_v29 = vpack.c.bf16 %v43_v28, %v41_v27  ;;  %v54_v30 = vld [vmem:[%s53_s23] sm:$0x1]  ;;  %vm77_vm1 = vcmask 523264   ;;  %v73_v34 = vsub.s32 1, %v464_v7  ;;  %s399_s25 = smov 64   ;;  %v47_v62 = vld [vmem:[%s573_s5 + $0x8] sm:$0xff] }
   0x9   :  { %341 = vmatpush1.bf16.msra.mxu0 %v340_v18  ;;  %v55_v31 = vmax.f32 %v54_v30, 0.0  ;;  %v45_v35 = vld [vmem:[%s572_s4] sm:$0x3]  ;;  %v400_v51 = vmov 1966171168   ;;  %v48_v63 = vld [vmem:[%s573_s5 + $0x10] sm:$0xff] }
   0xa   :  { %343 = vmatprep.subr.bf16.mxu0 %v342_v19  ;;  %v74_v36 = vrot.slane %v45_v35, %v73_v34  ;;  %v70_v40 = vrot.slane %v45_v35, %v492_v17  ;;  %v172_v52 = vunpack.c.l.s4 %v400_v51  ;;  %v46_v61 = vld [vmem:[%s573_s5] sm:$0xff]  ;;  %v401_v0 = vmov 0.0|0.0   ;;  %v49_v2 = vld [vmem:[%s573_s5 + $0x18] sm:$0xff]  ;;  %s403_s9 = smov [#allocation4]  }
   0xb   :  { %350 = vmatprep.subr.bf16.mxu1 %v401_v0  ;;  %v351_v1 = vpack.c.bf16 %v47_v62, %v46_v61  ;;  %vm402_vm2 = vmmov 0   ;;  %v354_v3 = vpack.c.bf16 %v49_v2, %v48_v63  ;;  %vm294_vm3 = vcmask 253952   ;;  %v50_v9 = vld [vmem:[%s574_s6] sm:$0x1]  ;;  %s304_s10 = sshll.u32 %s403_s9, 4  ;;  %s305_s10 = int_to_ptr.vmem [resolvable:$true] %s304_s10 }
   0xc   :  { %v173_v53 = vunpack.c.0.s8 %v172_v52  ;;  %331 = vmatprep.mubr.msk.f32.mxu1 %vm402_vm2, %v397_v12  ;;  %vm278_vm4 = vcmask 1040384   ;;  %s373_s11 = scalar_lea.vmem %s305_s10, 16  ;;  %s377_s12 = scalar_lea.vmem %s305_s10, 32 }
   0xd   :  { %345 = vmatpush1.bf16.msra.mxu0 %v344_v25  ;;  %352 = vmatpush3.bf16.msra.mxu1 %v351_v1  ;;  %p374_p0 = scmp.ne.s32.totalorder %s305_s10, %s373_s11  ;;  %p378_p1 = scmp.lt.s32.totalorder %s305_s10, %s305_s10 }
   0xe   :  { %347 = vmatprep.subr.bf16.mxu0 %v346_v26  ;;  %v176_v54 = vsub.s32 %v173_v53, %v464_v7  ;;  %353 = vmatprep.subr.bf16.mxu1 %v401_v0  ;;  %p379_p2 = scmp.lt.s32.totalorder %s377_s12, %s373_s11 }
  0x10   :  { %p380_p3 = por %p379_p2, %p378_p1 }
  0x11   :  { %349 = vmatpush1.bf16.msra.mxu0 %v348_v29  ;;  %355 = vmatpush3.bf16.msra.mxu1 %v354_v3 }
  0x12   :  { %p381_p4 = pnand %p380_p3, %p374_p0 }
  0x7a   :  { %v62_v32 = vpop.permute.xlu0 %61 }
  0x7b   :  { %v65_v33 = vsel %vm64_vm0, %v55_v31, %v62_v32 }
  0x7c   :  { %315 = vmatmul.mubr.msk.f32.vlgmr.msra.gmra.mrb[0].mxu0 %vm77_vm1, %v65_v33 }
 0x14f   :  { %v147_v37 = vpop.f32.mrb[0].mxu0 }
 0x150   :  { %v149_v38 = vpop.f32.mrb[1].mxu0  ;;  %v148_v41 = vadd.f32 %v147_v37, %v70_v40 }
 0x151   :  { %v150_v39 = vadd.f32 %v149_v38, %v74_v36 }
 0x153   :  { %160 = vrot.lane.b32.xlu0 %v150_v39, %s399_s25  ;;  %v152_v42 = vadd.f32 %v150_v39, %v148_v41 }
 0x155   :  { %v316_v43 = vmul.f32 -1.442695, %v152_v42 }
 0x157   :  { %363 = vpow2.f32 %v316_v43 }
 0x161   :  { %v364_v44 = vpop.eup %363 }
 0x162   :  { %v156_v45 = vadd.f32 1.0, %v364_v44 }
 0x164   :  { %365 = vrcp.f32 %v156_v45 }
 0x16e   :  { %v366_v46 = vpop.eup %365 }
 0x1c5   :  { %v161_v47 = vpop.permute.xlu0 %160 }
 0x1c6   :  { %v163_v48 = vmul.f32 %v366_v46, %v161_v47 }
 0x1c8   :  { %165 = vrot.lane.b32.xlu1 %v163_v48, %s399_s25 }
 0x23a   :  { %v166_v49 = vpop.permute.xlu1 %165 }
 0x23b   :  { %v168_v50 = vadd.f32 %v166_v49, %v148_v41 }
 0x23d   :  { %367 = vtanh.f32 %v168_v50 }
 0x247   :  { %v368_v55 = vpop.eup %367 }
 0x248   :  { %v177_v56 = vrot.slane %v368_v55, %v176_v54 }
 0x24a   :  { %v184_v57 = vrot.slane %v177_v56, %v176_v54 }
 0x24c   :  { %185 = vrot.lane.b32.xlu1 %v184_v57, %s399_s25 }
 0x2be   :  { %v186_v58 = vpop.permute.xlu1 %185 }
 0x2bf   :  { %v188_v59 = vsub.f32 %v483_v13, %v186_v58 }
 0x2c1   :  { %v193_v60 = vrot.slane %v188_v59, %v492_v17 }
 0x2c3   :  { %194 = vrot.lane.b32.xlu0 %v193_v60, %s398_s14 }
 0x335   :  { %v195_v4 = vpop.permute.xlu0 %194 }
 0x336   :  { %v197_v5 = vmul.f32 %v366_v46, %v195_v4 }
 0x338   :  { %199 = vrot.lane.b32.xlu1 %v197_v5, %s398_s14 }
 0x3aa   :  { %v200_v6 = vpop.permute.xlu1 %199 }
 0x3ab   :  { %v202_v7 = vadd.f32 %v368_v55, %v200_v6 }
 0x3ad   :  { %204 = vrot.lane.b32.xlu0 %v202_v7, %s399_s25 }
 0x41f   :  { %v205_v8 = vpop.permute.xlu0 %204 }
 0x420   :  { %332 = vmatmul.mubr.msk.f32.vlgmr.msra.gmra.mrb[0].mxu1 %vm64_vm0, %v205_v8  ;;  %295 = vst.msk [vmem:[#allocation4] sm:$0x1] %vm294_vm3, %v205_v8 }
 0x4f3   :  { %v274_v10 = vpop.f32.mrb[0].mxu1 }
 0x4f4   :  { %v275_v11 = vadd.f32 %v274_v10, %v50_v9  ;;  %v333_v12 = vpop.f32.mrb[1].mxu1 }
 0x4f6   :  { %v279_v13 = vsel %vm278_vm4, %v275_v11, -inf }
 0x4f7   :  { %280 = vmax.xlane.f32.xlu1 %v279_v13 }
 0x584   :  { %v281_v14 = vpop.xlane.xlu1 %280 }
 0x585   :  { %v282_v15 = vsub.f32 %v275_v11, %v281_v14 }
 0x587   :  { %v283_v16 = vmul.f32 1.442695, %v282_v15 }
 0x589   :  { %369 = vpow2.f32 %v283_v16 }
 0x593   :  { %v370_v17 = vpop.eup %369 }
 0x594   :  { %v285_v18 = vsel %vm278_vm4, %v370_v17, 0.0 }
 0x595   :  { %286 = vadd.xlane.f32.xlu0 %v285_v18 }
 0x596   :  { %384 = shalt.err (!%p381_p4)
}
 0x597   :  { %s385_s14 = scalar_lea.hbm %s576_s8, 16 }
 0x598   :  { %p386_p5 = scmp.ne.s32.totalorder %s576_s8, %s385_s14  ;;  %p389_p6 = scmp.lt.u32.totalorder %s385_s14, %s576_s8 }
 0x59a   :  { %p391_p7 = pnand %p389_p6, %p386_p5 }
 0x59c   :  { %394 = shalt.err (!%p391_p7)
}
 0x59d   :  { %307 = dma.vmem_to_hbm [thread:$0]  %s305_s10, 16, %s576_s8, [#allocation5]  }
 0x622   :  { %v287_v19 = vpop.xlane.xlu0 %286 }
 0x623   :  { %371 = vlog2.f32 %v287_v19 }
 0x62d   :  { %v372_v20 = vpop.eup %371 }
 0x62e   :  { %v289_v21 = vmul.f32 0.6931472, %v372_v20 }
 0x630   :  { %v290_v22 = vadd.f32 %v289_v21, %v281_v14 }
 0x632   :  { %v291_v23 = vsub.f32 %v275_v11, %v290_v22 }
 0x634   :  { %292 = vst [vmem:[%s575_s7] sm:$0x1] %v291_v23 }
 0x635   :  { %395 = dma.done.wait [#allocation5], 16  }
 0x636   :  { %396 = vsyncadd [#allocation5], 4294967280 }
 0x637   :  { %313 = vsyncpa [#allocation5], 1 }

</bundles_post_ra>
